<compile_context>
chip_gen: v7x
topology: tpu7x:2x2x1
jax: 0.10.0
libtpu: 0.0.40
codegen_flags: <defaults>
</compile_context>

<pallas_src>
import functools
import math

import jax
import jax.numpy as jnp
from jax.experimental import pallas as pl
from jax.experimental.pallas import tpu as pltpu

LANE = 128          # vreg lane width
NEG_SLOPE = 0.01    # F.leaky_relu default negative_slope
MAX_TM = 512        # batch-tile cap (multiple of 16 for bf16 inputs)


def _round_up(x, m):
    return ((x + m - 1) // m) * m


def _cdiv(a, b):
    return (a + b - 1) // b


def _vmem_limit_bytes():
    """Generation-aware VMEM budget: ~80% of physical capacity."""
    try:
        cap = int(pltpu.get_tpu_info().vmem_capacity_bytes)
    except Exception:
        cap = 64 * 1024 * 1024       # conservative; safe on every generation
    return max(32 * 1024 * 1024, int(cap * 8 // 10))


def _fused_mlp_kernel(x_ref, *refs, num_layers, in_features):
    """Whole MLP on one (tm, in_features) batch tile; activations stay in VMEM."""
    x_scr = refs[-1]                   # (tm, in_pad) bf16 scratch
    o_ref = refs[-2]
    wb = refs[:-2]                     # [w0, b0, w1, b1, ...]

    in_pad = x_scr.shape[-1]
    if in_features == in_pad:
        h = x_ref[...]                 # already lane-dense
    else:
        # Zero-extend the input tile to the padded lane width inside VMEM so
        # the first MXU dot sees a lane-dense bf16 operand (pad lanes exact 0).
        x_scr[...] = jnp.zeros_like(x_scr)
        x_scr[:, :in_features] = x_ref[...]
        h = x_scr[...]

    y = None
    for i in range(num_layers):
        w = wb[2 * i][...]             # bf16 (in_pad_i, out_pad_i)
        b = wb[2 * i + 1][...]         # f32  (1, out_pad_i)
        y = jnp.dot(h, w, preferred_element_type=jnp.float32) + b
        if i != num_layers - 1:
            # LeakyReLU in f32 (no bf16 VALU on v5e), then carry bf16.
            # Dropout == identity at inference.
            y = jnp.where(y >= 0, y, jnp.float32(NEG_SLOPE) * y)
            h = y.astype(jnp.bfloat16)
    o_ref[...] = y.astype(o_ref.dtype)


def _fused_mlp(x_rows, params_flat, *, num_layers, in_features, tm,
               fancy, vmem_limit):
    """x_rows: (B_pad, in_features) bf16 with B_pad % tm == 0."""
    B_pad = x_rows.shape[0]
    in_pad = params_flat[0].shape[0]
    out_pad = params_flat[-1].shape[-1]

    in_specs = [pl.BlockSpec((tm, in_features), lambda i: (i, 0))]
    for p in params_flat:
        if fancy:
            # Constant index_map -> fetched once; single buffer halves the
            # resident weight VMEM (matters once hidden sizes reach ~2-4K).
            spec = pl.BlockSpec(p.shape, lambda i: (0, 0),
                                pipeline_mode=pl.Buffered(1))
        else:
            spec = pl.BlockSpec(p.shape, lambda i: (0, 0))
        in_specs.append(spec)

    extra = {}
    if fancy:
        flops = 2 * B_pad * sum(
            int(params_flat[2 * i].shape[0]) * int(params_flat[2 * i].shape[1])
            for i in range(num_layers))
        bytes_accessed = (
            int(x_rows.size) * x_rows.dtype.itemsize
            + B_pad * int(out_pad) * 4
            + sum(int(p.size) * p.dtype.itemsize for p in params_flat))
        extra["cost_estimate"] = pl.CostEstimate(
            flops=flops, transcendentals=0, bytes_accessed=bytes_accessed)

    kernel = functools.partial(_fused_mlp_kernel, num_layers=num_layers,
                               in_features=in_features)
    return pl.pallas_call(
        kernel,
        out_shape=jax.ShapeDtypeStruct((B_pad, out_pad), jnp.float32),
        grid=(B_pad // tm,),
        in_specs=in_specs,
        out_specs=pl.BlockSpec((tm, out_pad), lambda i: (i, 0)),
        scratch_shapes=[pltpu.VMEM((tm, in_pad), jnp.bfloat16)],
        compiler_params=pltpu.CompilerParams(
            dimension_semantics=("parallel",),   # batch shards across TCs (v7x)
            vmem_limit_bytes=vmem_limit,
        ),
        **extra,
    )(x_rows, *params_flat)


def _forward_impl(x, params_flat, *, num_layers, in_features, output_size,
                  fancy, vmem_limit):
    # PyTorch does x = x.float(); the kernel consumes bf16 (identical to the
    # pre-MXU cast it would do anyway), halving the input HBM traffic.
    x = x.astype(jnp.bfloat16)
    B = x.shape[0]
    # Row padding only; lane padding happens inside the kernel (no padded f32
    # copy of x ever round-trips through HBM).
    B16 = _round_up(max(B, 1), 16)
    n_steps = _cdiv(B16, MAX_TM)
    tm = _round_up(_cdiv(B16, n_steps), 16)     # adaptive tile, small pad waste
    B_pad = n_steps * tm
    if B_pad != B:
        x = jnp.pad(x, ((0, B_pad - B), (0, 0)))
    out = _fused_mlp(x, params_flat, num_layers=num_layers,
                     in_features=in_features, tm=tm,
                     fancy=fancy, vmem_limit=vmem_limit)
    return out[:B, :output_size]


class DNNPallas:
    """JAX/Pallas equivalent of the PyTorch DNN module (inference semantics)."""

    def __init__(self, input_size, output_size, fc_layer_sizes, dropout, key):
        assert isinstance(fc_layer_sizes, list) and len(fc_layer_sizes) >= 2
        assert 0 < dropout < 1
        self.input_size = input_size
        self.output_size = output_size
        self.feature_list = [input_size] + fc_layer_sizes + [output_size]
        self.padded_features = [_round_up(f, LANE) for f in self.feature_list]
        self.num_layers = len(self.feature_list) - 1

        params = []
        for li, (in_f, out_f) in enumerate(
                zip(self.feature_list[:-1], self.feature_list[1:])):
            key, wk, bk = jax.random.split(key, 3)
            bound = 1.0 / math.sqrt(in_f)          # nn.Linear default init range
            # stored pre-transposed as (in, out); zero-padded to lane multiples
            w = jax.random.uniform(wk, (in_f, out_f), jnp.float32, -bound, bound)
            b = jax.random.uniform(bk, (1, out_f), jnp.float32, -bound, bound)
            in_p = self.padded_features[li]
            out_p = self.padded_features[li + 1]
            w_pad = jnp.zeros((in_p, out_p), jnp.float32).at[:in_f, :out_f].set(w)
            b_pad = jnp.zeros((1, out_p), jnp.float32).at[:, :out_f].set(b)
            params.append(w_pad.astype(jnp.bfloat16))   # bf16 weights feed the MXU
            params.append(b_pad)                        # f32 bias
        self.params_flat = tuple(params)

        self._vmem_limit = _vmem_limit_bytes()
        resident = 2 * sum(int(p.size) * p.dtype.itemsize
                           for p in self.params_flat)
        if resident + (8 << 20) > self._vmem_limit:
            # TODO(synk): weight-streaming / K-N-tiled fallback for very large
            # hidden sizes (fits v5e/v6e's 128 MiB but not v7x's 64 MiB VMEM)
            # is not implemented; whole-MLP residency is assumed.
            raise NotImplementedError(
                "Total padded weights exceed the VMEM budget; weight-streaming "
                "fallback not implemented.")

        # TODO(synk): training-mode dropout (pltpu.prng_random_bits mask) not
        # implemented; dropout is identity (eval/inference semantics).
        common = dict(num_layers=self.num_layers,
                      in_features=self.input_size,
                      output_size=self.output_size)
        self._fwd_fancy = jax.jit(functools.partial(
            _forward_impl, fancy=True, vmem_limit=self._vmem_limit, **common))
        self._fwd_plain = jax.jit(functools.partial(
            _forward_impl, fancy=False,
            vmem_limit=min(self._vmem_limit, 64 * 1024 * 1024), **common))
        self._fwd = None

    def __call__(self, x):
        if self._fwd is None:
            try:
                out = self._fwd_fancy(x, self.params_flat)
                jax.block_until_ready(out)
                self._fwd = self._fwd_fancy
                return out
            except Exception:
                # Conservative fallback if the local JAX build rejects
                # pipeline_mode=Buffered(1) or cost_estimate.
                self._fwd = self._fwd_plain
        return self._fwd(x, self.params_flat)


if __name__ == "__main__":
    key = jax.random.PRNGKey(0)
    key, xk, pk = jax.random.split(key, 3)

    batch = 8
    input_size = 16
    fc_layer_sizes = [32, 32]
    output_size = 8
    dropout = 0.5

    model = DNNPallas(input_size, output_size, fc_layer_sizes, dropout, pk)
    x = jax.random.normal(xk, (batch, input_size), jnp.float32)

    out = model(x)
    jax.block_until_ready(out)
    assert out.shape == (batch, output_size)

    # Plain-JAX reference with identical bf16/f32 mixed precision.
    in_pad = model.padded_features[0]
    h = jnp.pad(x.astype(jnp.bfloat16), ((0, 0), (0, in_pad - input_size)))
    y = None
    for i in range(model.num_layers):
        w = model.params_flat[2 * i]
        b = model.params_flat[2 * i + 1]
        y = jnp.dot(h, w, preferred_element_type=jnp.float32) + b
        if i != model.num_layers - 1:
            y = jnp.where(y >= 0, y, 0.01 * y)
            h = y.astype(jnp.bfloat16)
    ref = y[:, :output_size]

    assert jnp.allclose(out, ref, atol=1e-2, rtol=1e-2), (
        float(jnp.max(jnp.abs(out - ref))))

    print("KERNEL_OK")
</pallas_src>

<mosaic_0001>
module attributes {stable_mosaic.version = 11 : i64} {
  func.func @_fused_mlp_kernel(%arg0: i32, %arg1: memref<16x16xbf16, #tpu.memory_space<vmem>>, %arg2: memref<128x128xbf16, #tpu.memory_space<vmem>>, %arg3: memref<1x128xf32, #tpu.memory_space<vmem>>, %arg4: memref<128x128xbf16, #tpu.memory_space<vmem>>, %arg5: memref<1x128xf32, #tpu.memory_space<vmem>>, %arg6: memref<128x128xbf16, #tpu.memory_space<vmem>>, %arg7: memref<1x128xf32, #tpu.memory_space<vmem>>, %arg8: memref<16x128xf32, #tpu.memory_space<vmem>>, %arg9: memref<16x128xbf16, #tpu.memory_space<vmem>>) attributes {dimension_semantics = [#tpu.dimension_semantics<parallel>], iteration_bounds = array<i64: 1>, scalar_prefetch = 0 : i64, scratch_operands = 1 : i64, tpu.core_type = #tpu.core_type<tc>, window_params = [{transform_indices = @transform_0, window_bounds = array<i64: 16, 16>}, {pipeline_mode = #tpu.pipeline_mode<synchronous>, transform_indices = @transform_1, window_bounds = array<i64: 128, 128>}, {pipeline_mode = #tpu.pipeline_mode<synchronous>, transform_indices = @transform_2, window_bounds = array<i64: 1, 128>}, {pipeline_mode = #tpu.pipeline_mode<synchronous>, transform_indices = @transform_3, window_bounds = array<i64: 128, 128>}, {pipeline_mode = #tpu.pipeline_mode<synchronous>, transform_indices = @transform_4, window_bounds = array<i64: 1, 128>}, {pipeline_mode = #tpu.pipeline_mode<synchronous>, transform_indices = @transform_5, window_bounds = array<i64: 128, 128>}, {pipeline_mode = #tpu.pipeline_mode<synchronous>, transform_indices = @transform_6, window_bounds = array<i64: 1, 128>}, {transform_indices = @transform_7, window_bounds = array<i64: 16, 128>}]} {
    %cst = arith.constant 0.000000e+00 : bf16
    %0 = vector.broadcast %cst : bf16 to vector<16x128xbf16>
    %c0 = arith.constant 0 : index
    %c0_0 = arith.constant 0 : index
    %1 = vector.load %arg9[%c0, %c0_0] : memref<16x128xbf16, #tpu.memory_space<vmem>>, vector<16x128xbf16>
    tpu.vector_store %arg9[%c0, %c0_0], %0 {strides = array<i32>} : memref<16x128xbf16, #tpu.memory_space<vmem>>, vector<16x128xbf16>,
    %c0_1 = arith.constant 0 : index
    %c0_2 = arith.constant 0 : index
    %2 = vector.load %arg1[%c0_1, %c0_2] : memref<16x16xbf16, #tpu.memory_space<vmem>>, vector<16x16xbf16>
    %c0_3 = arith.constant 0 : index
    %c0_4 = arith.constant 0 : index
    %3 = vector.load %arg9[%c0_3, %c0_4] : memref<16x128xbf16, #tpu.memory_space<vmem>>, vector<16x16xbf16>
    tpu.vector_store %arg9[%c0_3, %c0_4], %2 {strides = array<i32>} : memref<16x128xbf16, #tpu.memory_space<vmem>>, vector<16x16xbf16>,
    %c0_5 = arith.constant 0 : index
    %c0_6 = arith.constant 0 : index
    %4 = vector.load %arg9[%c0_5, %c0_6] : memref<16x128xbf16, #tpu.memory_space<vmem>>, vector<16x128xbf16>
    %c0_7 = arith.constant 0 : index
    %c0_8 = arith.constant 0 : index
    %5 = vector.load %arg2[%c0_7, %c0_8] : memref<128x128xbf16, #tpu.memory_space<vmem>>, vector<128x128xbf16>
    %c0_9 = arith.constant 0 : index
    %c0_10 = arith.constant 0 : index
    %6 = vector.load %arg3[%c0_9, %c0_10] : memref<1x128xf32, #tpu.memory_space<vmem>>, vector<1x128xf32>
    %cst_11 = arith.constant dense<0.000000e+00> : vector<16x128xf32>
    %7 = tpu.matmul %4, %5, %cst_11 {dimension_numbers = #tpu.dot_dimension_numbers<[1], [0], [0], [1], [0, 0, 1, 1], [], []>} : vector<16x128xbf16>, vector<128x128xbf16>, vector<16x128xf32> -> vector<16x128xf32>
    %8 = vector.broadcast %6 : vector<1x128xf32> to vector<16x128xf32>
    %9 = arith.addf %7, %8 : vector<16x128xf32>
    %cst_12 = arith.constant 0.000000e+00 : f32
    %10 = vector.broadcast %cst_12 : f32 to vector<16x128xf32>
    %11 = arith.cmpf oge, %9, %10 : vector<16x128xf32>
    %cst_13 = arith.constant 0.00999999977 : f32
    %12 = vector.broadcast %cst_13 : f32 to vector<16x128xf32>
    %13 = arith.mulf %12, %9 : vector<16x128xf32>
    %14 = arith.select %11, %9, %13 : vector<16x128xi1>, vector<16x128xf32>
    %15 = arith.truncf %14 : vector<16x128xf32> to vector<16x128xbf16>
    %c0_14 = arith.constant 0 : index
    %c0_15 = arith.constant 0 : index
    %16 = vector.load %arg4[%c0_14, %c0_15] : memref<128x128xbf16, #tpu.memory_space<vmem>>, vector<128x128xbf16>
    %c0_16 = arith.constant 0 : index
    %c0_17 = arith.constant 0 : index
    %17 = vector.load %arg5[%c0_16, %c0_17] : memref<1x128xf32, #tpu.memory_space<vmem>>, vector<1x128xf32>
    %cst_18 = arith.constant dense<0.000000e+00> : vector<16x128xf32>
    %18 = tpu.matmul %15, %16, %cst_18 {dimension_numbers = #tpu.dot_dimension_numbers<[1], [0], [0], [1], [0, 0, 1, 1], [], []>} : vector<16x128xbf16>, vector<128x128xbf16>, vector<16x128xf32> -> vector<16x128xf32>
    %19 = vector.broadcast %17 : vector<1x128xf32> to vector<16x128xf32>
    %20 = arith.addf %18, %19 : vector<16x128xf32>
    %cst_19 = arith.constant 0.000000e+00 : f32
    %21 = vector.broadcast %cst_19 : f32 to vector<16x128xf32>
    %22 = arith.cmpf oge, %20, %21 : vector<16x128xf32>
    %cst_20 = arith.constant 0.00999999977 : f32
    %23 = vector.broadcast %cst_20 : f32 to vector<16x128xf32>
    %24 = arith.mulf %23, %20 : vector<16x128xf32>
    %25 = arith.select %22, %20, %24 : vector<16x128xi1>, vector<16x128xf32>
    %26 = arith.truncf %25 : vector<16x128xf32> to vector<16x128xbf16>
    %c0_21 = arith.constant 0 : index
    %c0_22 = arith.constant 0 : index
    %27 = vector.load %arg6[%c0_21, %c0_22] : memref<128x128xbf16, #tpu.memory_space<vmem>>, vector<128x128xbf16>
    %c0_23 = arith.constant 0 : index
    %c0_24 = arith.constant 0 : index
    %28 = vector.load %arg7[%c0_23, %c0_24] : memref<1x128xf32, #tpu.memory_space<vmem>>, vector<1x128xf32>
    %cst_25 = arith.constant dense<0.000000e+00> : vector<16x128xf32>
    %29 = tpu.matmul %26, %27, %cst_25 {dimension_numbers = #tpu.dot_dimension_numbers<[1], [0], [0], [1], [0, 0, 1, 1], [], []>} : vector<16x128xbf16>, vector<128x128xbf16>, vector<16x128xf32> -> vector<16x128xf32>
    %30 = vector.broadcast %28 : vector<1x128xf32> to vector<16x128xf32>
    %31 = arith.addf %29, %30 : vector<16x128xf32>
    %c0_26 = arith.constant 0 : index
    %c0_27 = arith.constant 0 : index
    %32 = vector.load %arg8[%c0_26, %c0_27] : memref<16x128xf32, #tpu.memory_space<vmem>>, vector<16x128xf32>
    tpu.vector_store %arg8[%c0_26, %c0_27], %31 {strides = array<i32>} : memref<16x128xf32, #tpu.memory_space<vmem>>, vector<16x128xf32>,
    return
  }
  func.func @transform_0(%arg0: i32) -> (i32, i32) {
    %c0_i32 = arith.constant 0 : i32
    %c0_i32_0 = arith.constant 0 : i32
    return %arg0, %c0_i32 : i32, i32
  }
  func.func @transform_1(%arg0: i32) -> (i32, i32) {
    %c0_i32 = arith.constant 0 : i32
    %c0_i32_0 = arith.constant 0 : i32
    %c0_i32_1 = arith.constant 0 : i32
    return %c0_i32, %c0_i32_0 : i32, i32
  }
  func.func @transform_2(%arg0: i32) -> (i32, i32) {
    %c0_i32 = arith.constant 0 : i32
    %c0_i32_0 = arith.constant 0 : i32
    %c0_i32_1 = arith.constant 0 : i32
    return %c0_i32, %c0_i32_0 : i32, i32
  }
  func.func @transform_3(%arg0: i32) -> (i32, i32) {
    %c0_i32 = arith.constant 0 : i32
    %c0_i32_0 = arith.constant 0 : i32
    %c0_i32_1 = arith.constant 0 : i32
    return %c0_i32, %c0_i32_0 : i32, i32
  }
  func.func @transform_4(%arg0: i32) -> (i32, i32) {
    %c0_i32 = arith.constant 0 : i32
    %c0_i32_0 = arith.constant 0 : i32
    %c0_i32_1 = arith.constant 0 : i32
    return %c0_i32, %c0_i32_0 : i32, i32
  }
  func.func @transform_5(%arg0: i32) -> (i32, i32) {
    %c0_i32 = arith.constant 0 : i32
    %c0_i32_0 = arith.constant 0 : i32
    %c0_i32_1 = arith.constant 0 : i32
    return %c0_i32, %c0_i32_0 : i32, i32
  }
  func.func @transform_6(%arg0: i32) -> (i32, i32) {
    %c0_i32 = arith.constant 0 : i32
    %c0_i32_0 = arith.constant 0 : i32
    %c0_i32_1 = arith.constant 0 : i32
    return %c0_i32, %c0_i32_0 : i32, i32
  }
  func.func @transform_7(%arg0: i32) -> (i32, i32) {
    %c0_i32 = arith.constant 0 : i32
    %c0_i32_0 = arith.constant 0 : i32
    return %arg0, %c0_i32 : i32, i32
  }
}

module attributes {stable_mosaic.version = 11 : i64} {
  func.func @_fused_mlp_kernel(%arg0: i32, %arg1: memref<16x16xbf16, #tpu.memory_space<vmem>>, %arg2: memref<128x128xbf16, #tpu.memory_space<vmem>>, %arg3: memref<1x128xf32, #tpu.memory_space<vmem>>, %arg4: memref<128x128xbf16, #tpu.memory_space<vmem>>, %arg5: memref<1x128xf32, #tpu.memory_space<vmem>>, %arg6: memref<128x128xbf16, #tpu.memory_space<vmem>>, %arg7: memref<1x128xf32, #tpu.memory_space<vmem>>, %arg8: memref<16x128xf32, #tpu.memory_space<vmem>>, %arg9: memref<16x128xbf16, #tpu.memory_space<vmem>>) attributes {dimension_semantics = [#tpu.dimension_semantics<parallel>], iteration_bounds = array<i64: 1>, scalar_prefetch = 0 : i64, scratch_operands = 1 : i64, tpu.core_type = #tpu.core_type<tc>, window_params = [{transform_indices = @transform_0, window_bounds = array<i64: 16, 16>}, {pipeline_mode = #tpu.pipeline_mode<synchronous>, transform_indices = @transform_1, window_bounds = array<i64: 128, 128>}, {pipeline_mode = #tpu.pipeline_mode<synchronous>, transform_indices = @transform_2, window_bounds = array<i64: 1, 128>}, {pipeline_mode = #tpu.pipeline_mode<synchronous>, transform_indices = @transform_3, window_bounds = array<i64: 128, 128>}, {pipeline_mode = #tpu.pipeline_mode<synchronous>, transform_indices = @transform_4, window_bounds = array<i64: 1, 128>}, {pipeline_mode = #tpu.pipeline_mode<synchronous>, transform_indices = @transform_5, window_bounds = array<i64: 128, 128>}, {pipeline_mode = #tpu.pipeline_mode<synchronous>, transform_indices = @transform_6, window_bounds = array<i64: 1, 128>}, {transform_indices = @transform_7, window_bounds = array<i64: 16, 128>}]} {
    %cst = arith.constant 0.000000e+00 : bf16
    %0 = vector.broadcast %cst : bf16 to vector<16x128xbf16>
    %c0 = arith.constant 0 : index
    %c0_0 = arith.constant 0 : index
    %1 = vector.load %arg9[%c0, %c0_0] : memref<16x128xbf16, #tpu.memory_space<vmem>>, vector<16x128xbf16>
    tpu.vector_store %arg9[%c0, %c0_0], %0 {strides = array<i32>} : memref<16x128xbf16, #tpu.memory_space<vmem>>, vector<16x128xbf16>,
    %c0_1 = arith.constant 0 : index
    %c0_2 = arith.constant 0 : index
    %2 = vector.load %arg1[%c0_1, %c0_2] : memref<16x16xbf16, #tpu.memory_space<vmem>>, vector<16x16xbf16>
    %c0_3 = arith.constant 0 : index
    %c0_4 = arith.constant 0 : index
    %3 = vector.load %arg9[%c0_3, %c0_4] : memref<16x128xbf16, #tpu.memory_space<vmem>>, vector<16x16xbf16>
    tpu.vector_store %arg9[%c0_3, %c0_4], %2 {strides = array<i32>} : memref<16x128xbf16, #tpu.memory_space<vmem>>, vector<16x16xbf16>,
    %c0_5 = arith.constant 0 : index
    %c0_6 = arith.constant 0 : index
    %4 = vector.load %arg9[%c0_5, %c0_6] : memref<16x128xbf16, #tpu.memory_space<vmem>>, vector<16x128xbf16>
    %c0_7 = arith.constant 0 : index
    %c0_8 = arith.constant 0 : index
    %5 = vector.load %arg2[%c0_7, %c0_8] : memref<128x128xbf16, #tpu.memory_space<vmem>>, vector<128x128xbf16>
    %c0_9 = arith.constant 0 : index
    %c0_10 = arith.constant 0 : index
    %6 = vector.load %arg3[%c0_9, %c0_10] : memref<1x128xf32, #tpu.memory_space<vmem>>, vector<1x128xf32>
    %cst_11 = arith.constant dense<0.000000e+00> : vector<16x128xf32>
    %7 = tpu.matmul %4, %5, %cst_11 {dimension_numbers = #tpu.dot_dimension_numbers<[1], [0], [0], [1], [0, 0, 1, 1], [], []>} : vector<16x128xbf16>, vector<128x128xbf16>, vector<16x128xf32> -> vector<16x128xf32>
    %8 = vector.broadcast %6 : vector<1x128xf32> to vector<16x128xf32>
    %9 = arith.addf %7, %8 : vector<16x128xf32>
    %cst_12 = arith.constant 0.000000e+00 : f32
    %10 = vector.broadcast %cst_12 : f32 to vector<16x128xf32>
    %11 = arith.cmpf oge, %9, %10 : vector<16x128xf32>
    %cst_13 = arith.constant 0.00999999977 : f32
    %12 = vector.broadcast %cst_13 : f32 to vector<16x128xf32>
    %13 = arith.mulf %12, %9 : vector<16x128xf32>
    %14 = arith.select %11, %9, %13 : vector<16x128xi1>, vector<16x128xf32>
    %15 = arith.truncf %14 : vector<16x128xf32> to vector<16x128xbf16>
    %c0_14 = arith.constant 0 : index
    %c0_15 = arith.constant 0 : index
    %16 = vector.load %arg4[%c0_14, %c0_15] : memref<128x128xbf16, #tpu.memory_space<vmem>>, vector<128x128xbf16>
    %c0_16 = arith.constant 0 : index
    %c0_17 = arith.constant 0 : index
    %17 = vector.load %arg5[%c0_16, %c0_17] : memref<1x128xf32, #tpu.memory_space<vmem>>, vector<1x128xf32>
    %cst_18 = arith.constant dense<0.000000e+00> : vector<16x128xf32>
    %18 = tpu.matmul %15, %16, %cst_18 {dimension_numbers = #tpu.dot_dimension_numbers<[1], [0], [0], [1], [0, 0, 1, 1], [], []>} : vector<16x128xbf16>, vector<128x128xbf16>, vector<16x128xf32> -> vector<16x128xf32>
    %19 = vector.broadcast %17 : vector<1x128xf32> to vector<16x128xf32>
    %20 = arith.addf %18, %19 : vector<16x128xf32>
    %cst_19 = arith.constant 0.000000e+00 : f32
    %21 = vector.broadcast %cst_19 : f32 to vector<16x128xf32>
    %22 = arith.cmpf oge, %20, %21 : vector<16x128xf32>
    %cst_20 = arith.constant 0.00999999977 : f32
    %23 = vector.broadcast %cst_20 : f32 to vector<16x128xf32>
    %24 = arith.mulf %23, %20 : vector<16x128xf32>
    %25 = arith.select %22, %20, %24 : vector<16x128xi1>, vector<16x128xf32>
    %26 = arith.truncf %25 : vector<16x128xf32> to vector<16x128xbf16>
    %c0_21 = arith.constant 0 : index
    %c0_22 = arith.constant 0 : index
    %27 = vector.load %arg6[%c0_21, %c0_22] : memref<128x128xbf16, #tpu.memory_space<vmem>>, vector<128x128xbf16>
    %c0_23 = arith.constant 0 : index
    %c0_24 = arith.constant 0 : index
    %28 = vector.load %arg7[%c0_23, %c0_24] : memref<1x128xf32, #tpu.memory_space<vmem>>, vector<1x128xf32>
    %cst_25 = arith.constant dense<0.000000e+00> : vector<16x128xf32>
    %29 = tpu.matmul %26, %27, %cst_25 {dimension_numbers = #tpu.dot_dimension_numbers<[1], [0], [0], [1], [0, 0, 1, 1], [], []>} : vector<16x128xbf16>, vector<128x128xbf16>, vector<16x128xf32> -> vector<16x128xf32>
    %30 = vector.broadcast %28 : vector<1x128xf32> to vector<16x128xf32>
    %31 = arith.addf %29, %30 : vector<16x128xf32>
    %c0_26 = arith.constant 0 : index
    %c0_27 = arith.constant 0 : index
    %32 = vector.load %arg8[%c0_26, %c0_27] : memref<16x128xf32, #tpu.memory_space<vmem>>, vector<16x128xf32>
    tpu.vector_store %arg8[%c0_26, %c0_27], %31 {strides = array<i32>} : memref<16x128xf32, #tpu.memory_space<vmem>>, vector<16x128xf32>,
    return
  }
  func.func @transform_0(%arg0: i32) -> (i32, i32) {
    %c0_i32 = arith.constant 0 : i32
    %c0_i32_0 = arith.constant 0 : i32
    return %arg0, %c0_i32 : i32, i32
  }
  func.func @transform_1(%arg0: i32) -> (i32, i32) {
    %c0_i32 = arith.constant 0 : i32
    %c0_i32_0 = arith.constant 0 : i32
    %c0_i32_1 = arith.constant 0 : i32
    return %c0_i32, %c0_i32_0 : i32, i32
  }
  func.func @transform_2(%arg0: i32) -> (i32, i32) {
    %c0_i32 = arith.constant 0 : i32
    %c0_i32_0 = arith.constant 0 : i32
    %c0_i32_1 = arith.constant 0 : i32
    return %c0_i32, %c0_i32_0 : i32, i32
  }
  func.func @transform_3(%arg0: i32) -> (i32, i32) {
    %c0_i32 = arith.constant 0 : i32
    %c0_i32_0 = arith.constant 0 : i32
    %c0_i32_1 = arith.constant 0 : i32
    return %c0_i32, %c0_i32_0 : i32, i32
  }
  func.func @transform_4(%arg0: i32) -> (i32, i32) {
    %c0_i32 = arith.constant 0 : i32
    %c0_i32_0 = arith.constant 0 : i32
    %c0_i32_1 = arith.constant 0 : i32
    return %c0_i32, %c0_i32_0 : i32, i32
  }
  func.func @transform_5(%arg0: i32) -> (i32, i32) {
    %c0_i32 = arith.constant 0 : i32
    %c0_i32_0 = arith.constant 0 : i32
    %c0_i32_1 = arith.constant 0 : i32
    return %c0_i32, %c0_i32_0 : i32, i32
  }
  func.func @transform_6(%arg0: i32) -> (i32, i32) {
    %c0_i32 = arith.constant 0 : i32
    %c0_i32_0 = arith.constant 0 : i32
    %c0_i32_1 = arith.constant 0 : i32
    return %c0_i32, %c0_i32_0 : i32, i32
  }
  func.func @transform_7(%arg0: i32) -> (i32, i32) {
    %c0_i32 = arith.constant 0 : i32
    %c0_i32_0 = arith.constant 0 : i32
    return %arg0, %c0_i32 : i32, i32
  }
}

</mosaic_0001>

<bundles_post_ra>
// kernel: _forward_impl.1
= control target key start
LH: loop header
LB: loop body
LE: loop exit
PB: predicated region body
PF: predicated region fallthrough
CT: control target
= control target key end

     0   :  { %12 = vsyncpa [#allocation4], 0  ;;  %s804_s0 = inlined_call_operand.vmem [shape: bf16[16,16], index: 0, kind: input, shape index: {}]   ;;  %s805_s1 = inlined_call_operand.hbm [shape: bf16[128,128], index: 1, kind: input, shape index: {}]   ;;  %s806_s2 = inlined_call_operand.vmem [shape: f32[1,128], index: 2, kind: input, shape index: {}]   ;;  %s807_s3 = inlined_call_operand.hbm [shape: bf16[128,128], index: 3, kind: input, shape index: {}]   ;;  %s808_s4 = inlined_call_operand.vmem [shape: f32[1,128], index: 4, kind: input, shape index: {}]   ;;  %s809_s5 = inlined_call_operand.hbm [shape: bf16[128,128], index: 5, kind: input, shape index: {}]   ;;  %s810_s6 = inlined_call_operand.vmem [shape: f32[1,128], index: 6, kind: input, shape index: {}]   ;;  %s811_s7 = inlined_call_operand.vmem [shape: f32[16,128], index: 7, kind: output, shape index: {}]  }
   0x1   :  { %13 = vsyncpa [#allocation6], 0  ;;  %s656_s24 = smov [#allocation5]   ;;  %s657_s26 = smov [#allocation3]  }
   0x2   :  { %s35_s25 = sshll.u32 %s656_s24, 4  ;;  %s21_s27 = sshll.u32 %s657_s26, 4  ;;  %s36_s25 = int_to_ptr.vmem [resolvable:$true] %s35_s25  ;;  %s704_s27 = int_to_ptr.vmem [resolvable:$true] %s21_s27 }
   0x3   :  { %s586_s30 = scalar_lea.hbm %s807_s3, 1024 }
   0x4   :  { %p587_p0 = scmp.ne.s32.totalorder %s807_s3, %s586_s30  ;;  %p590_p1 = scmp.lt.u32.totalorder %s586_s30, %s807_s3 }
   0x6   :  { %p592_p2 = pnand %p590_p1, %p587_p0 }
   0x8   :  { %595 = shalt.err (!%p592_p2)
}
   0x9   :  { %s596_s12 = scalar_lea.vmem %s36_s25, 1024  ;;  %p601_p4 = scmp.lt.s32.totalorder %s36_s25, %s36_s25 }
   0xa   :  { %p597_p3 = scmp.ne.s32.totalorder %s36_s25, %s596_s12  ;;  %p602_p5 = scmp.lt.s32.totalorder %s596_s12, %s596_s12 }
   0xc   :  { %p603_p6 = por %p602_p5, %p601_p4 }
   0xe   :  { %p604_p7 = pnand %p603_p6, %p597_p3 }
  0x10   :  { %607 = shalt.err (!%p604_p7)
}
  0x11   :  { %s658_s13 = smov 64   ;;  %s659_s14 = smov 4  }
  0x12   :  { %41 = dma.hbm_to_vmem [thread:$0]  %s807_s3, 1024, %s36_s25, [#allocation6], %s658_s13, %s658_s13, %s659_s14  }
  0x13   :  { %s608_s19 = scalar_lea.hbm %s805_s1, 1024 }
  0x14   :  { %p609_p8 = scmp.ne.s32.totalorder %s805_s1, %s608_s19  ;;  %p612_p9 = scmp.lt.u32.totalorder %s608_s19, %s805_s1 }
  0x16   :  { %p614_p10 = pnand %p612_p9, %p609_p8 }
  0x18   :  { %617 = shalt.err (!%p614_p10)
}
  0x19   :  { %s618_s24 = scalar_lea.vmem %s704_s27, 1024  ;;  %p623_p12 = scmp.lt.s32.totalorder %s704_s27, %s704_s27 }
  0x1a   :  { %p619_p11 = scmp.ne.s32.totalorder %s704_s27, %s618_s24  ;;  %p624_p13 = scmp.lt.s32.totalorder %s618_s24, %s618_s24 }
  0x1c   :  { %p625_p0 = por %p624_p13, %p623_p12 }
  0x1e   :  { %p626_p1 = pnand %p625_p0, %p619_p11 }
  0x20   :  { %629 = shalt.err (!%p626_p1)
}
  0x21   :  { %27 = dma.hbm_to_vmem [thread:$0]  %s805_s1, 1024, %s704_s27, [#allocation4], %s658_s13, %s658_s13, %s659_s14  }
  0x22   :  { %s660_s26 = smov [#allocation7]   ;;  %s630_s8 = scalar_lea.hbm %s809_s5, 1024 }
  0x23   :  { %s49_s28 = sshll.u32 %s660_s26, 4  ;;  %p631_p2 = scmp.ne.s32.totalorder %s809_s5, %s630_s8  ;;  %s50_s28 = int_to_ptr.vmem [resolvable:$true] %s49_s28 }
  0x24   :  { %p634_p3 = scmp.lt.u32.totalorder %s630_s8, %s809_s5 }
  0x26   :  { %p636_p4 = pnand %p634_p3, %p631_p2 }
  0x28   :  { %639 = shalt.err (!%p636_p4)
}
  0x29   :  { %s640_s15 = scalar_lea.vmem %s50_s28, 1024  ;;  %p645_p6 = scmp.lt.s32.totalorder %s50_s28, %s50_s28 }
  0x2a   :  { %p641_p5 = scmp.ne.s32.totalorder %s50_s28, %s640_s15  ;;  %p646_p7 = scmp.lt.s32.totalorder %s640_s15, %s640_s15 }
  0x2c   :  { %p647_p8 = por %p646_p7, %p645_p6 }
  0x2e   :  { %p648_p9 = pnand %p647_p8, %p641_p5 }
  0x30   :  { %651 = shalt.err (!%p648_p9)
}
  0x31   :  { %55 = dma.hbm_to_vmem [thread:$0]  %s809_s5, 1024, %s50_s28, [#allocation6], %s658_s13, %s658_s13, %s659_s14  }
  0x32   :  { %652 = dma.done.wait [#allocation4], 1024  }
  0x33   :  { %653 = vsyncadd [#allocation4], 4294966272 }
  0x34   :  { %654 = dma.done.wait [#allocation6], 2048  }
  0x35   :  { %655 = vsyncadd [#allocation6], 4294965248  ;;  %v661_v0 = vmov 0.0   ;;  %vm662_vm0 = vmmov 0   ;;  %v663_v1 = vmov 0   ;;  %v561_v2 = vld [vmem:[#allocation3] sm:$0xff]  }
  0x36   :  { %493 = vmatprep.subr.bf16.mxu0 %v661_v0  ;;  %509 = vmatprep.mubr.msk.bf16.mxu0 %vm662_vm0, %v661_v0  ;;  %68 = vst [vmem:[#allocation2] sm:$0xff] %v663_v1  ;;  %v562_v3 = vld [vmem:[#allocation3 + $0x8] sm:$0xff]   ;;  %v563_v4 = vld [vmem:[#allocation3 + $0x10] sm:$0xff]   ;;  %vm77_vm1 = vcmask 130048   ;;  %v569_v5 = vld [vmem:[%s804_s0] sm:$0xff]  }
  0x37   :  { %513 = vmatprep.subr.bf16.mxu1 %v661_v0  ;;  %529 = vmatprep.mubr.msk.bf16.mxu1 %vm662_vm0, %v661_v0  ;;  %v570_v6 = vld [vmem:[#allocation5] sm:$0xff]   ;;  %v564_v7 = vld [vmem:[#allocation3 + $0x18] sm:$0xff]   ;;  %78 = vst.msk [vmem:[#allocation2] sm:$0xff] %vm77_vm1, %v569_v5  ;;  %v571_v8 = vld [vmem:[#allocation5 + $0x8] sm:$0xff]  }
  0x38   :  { %494 = vmatpush3.bf16.msra.mxu0 %v561_v2  ;;  %514 = vmatpush3.bf16.msra.mxu1 %v570_v6  ;;  %v565_v9 = vld [vmem:[#allocation3 + $0x20] sm:$0xff]   ;;  %v572_v10 = vld [vmem:[#allocation5 + $0x10] sm:$0xff]   ;;  %v566_v11 = vld [vmem:[#allocation3 + $0x28] sm:$0xff]  }
  0x39   :  { %495 = vmatprep.subr.bf16.mxu0 %v661_v0  ;;  %515 = vmatprep.subr.bf16.mxu1 %v661_v0  ;;  %v573_v12 = vld [vmem:[#allocation5 + $0x18] sm:$0xff]   ;;  %v567_v13 = vld [vmem:[#allocation3 + $0x30] sm:$0xff]   ;;  %v574_v14 = vld [vmem:[#allocation5 + $0x20] sm:$0xff]  }
  0x3a   :  { %v568_v15 = vld [vmem:[#allocation3 + $0x38] sm:$0xff]   ;;  %v575_v16 = vld [vmem:[#allocation5 + $0x28] sm:$0xff]   ;;  %v576_v18 = vld [vmem:[#allocation5 + $0x30] sm:$0xff]  }
  0x3b   :  { %v577_v19 = vld [vmem:[#allocation5 + $0x38] sm:$0xff]   ;;  %v578_v20 = vld [vmem:[#allocation7] sm:$0xff]   ;;  %v579_v21 = vld [vmem:[#allocation7 + $0x8] sm:$0xff]  }
  0x3c   :  { %496 = vmatpush3.bf16.msra.mxu0 %v562_v3  ;;  %516 = vmatpush3.bf16.msra.mxu1 %v571_v8  ;;  %v580_v22 = vld [vmem:[#allocation7 + $0x10] sm:$0xff]   ;;  %v581_v23 = vld [vmem:[#allocation7 + $0x18] sm:$0xff]   ;;  %v582_v24 = vld [vmem:[#allocation7 + $0x20] sm:$0xff]  }
  0x3d   :  { %497 = vmatprep.subr.bf16.mxu0 %v661_v0  ;;  %517 = vmatprep.subr.bf16.mxu1 %v661_v0  ;;  %v583_v25 = vld [vmem:[#allocation7 + $0x28] sm:$0xff]   ;;  %v439_v26 = vld [vmem:[%s806_s2] ss:$0 sm:$0xff]  ;;  %v584_v38 = vld [vmem:[#allocation7 + $0x30] sm:$0xff]  }
  0x3e   :  { %v79_v17 = vld [vmem:[#allocation2] sm:$0xff] }
  0x3f   :  { %v585_v39 = vld [vmem:[#allocation7 + $0x38] sm:$0xff]  }
  0x40   :  { %498 = vmatpush3.bf16.msra.mxu0 %v563_v4  ;;  %518 = vmatpush3.bf16.msra.mxu1 %v572_v10  ;;  %v448_v40 = vld [vmem:[%s808_s4] ss:$0 sm:$0xff] }
  0x41   :  { %499 = vmatprep.subr.bf16.mxu0 %v661_v0  ;;  %519 = vmatprep.subr.bf16.mxu1 %v661_v0  ;;  %v457_v52 = vld [vmem:[%s810_s6] ss:$0 sm:$0xff] }
  0x44   :  { %500 = vmatpush3.bf16.msra.mxu0 %v564_v7  ;;  %520 = vmatpush3.bf16.msra.mxu1 %v573_v12 }
  0x45   :  { %501 = vmatprep.subr.bf16.mxu0 %v661_v0  ;;  %521 = vmatprep.subr.bf16.mxu1 %v661_v0 }
  0x48   :  { %502 = vmatpush3.bf16.msra.mxu0 %v565_v9  ;;  %522 = vmatpush3.bf16.msra.mxu1 %v574_v14 }
  0x49   :  { %503 = vmatprep.subr.bf16.mxu0 %v661_v0  ;;  %523 = vmatprep.subr.bf16.mxu1 %v661_v0 }
  0x4c   :  { %504 = vmatpush3.bf16.msra.mxu0 %v566_v11  ;;  %524 = vmatpush3.bf16.msra.mxu1 %v575_v16 }
  0x4d   :  { %505 = vmatprep.subr.bf16.mxu0 %v661_v0  ;;  %525 = vmatprep.subr.bf16.mxu1 %v661_v0 }
  0x50   :  { %506 = vmatpush3.bf16.msra.mxu0 %v567_v13  ;;  %526 = vmatpush3.bf16.msra.mxu1 %v576_v18 }
  0x51   :  { %507 = vmatprep.subr.bf16.mxu0 %v661_v0  ;;  %527 = vmatprep.subr.bf16.mxu1 %v661_v0 }
  0x54   :  { %508 = vmatpush3.bf16.msra.mxu0 %v568_v15  ;;  %528 = vmatpush3.bf16.msra.mxu1 %v577_v19 }
  0x55   :  { %533 = vmatprep.subr.bf16.mxu0 %v661_v0 }
  0x57   :  { %510 = vmatmul.mubr.bf16.vlgmr.msra.gmra.mrb[0].mxu0 %v79_v17 }
  0x58   :  { %549 = vmatprep.mubr.msk.bf16.mxu0 %vm662_vm0, %v661_v0  ;;  %534 = vmatpush3.bf16.msra.mxu0 %v578_v20 }
  0x59   :  { %535 = vmatprep.subr.bf16.mxu0 %v661_v0 }
  0x5c   :  { %536 = vmatpush3.bf16.msra.mxu0 %v579_v21 }
  0x5d   :  { %537 = vmatprep.subr.bf16.mxu0 %v661_v0 }
  0x60   :  { %538 = vmatpush3.bf16.msra.mxu0 %v580_v22 }
  0x61   :  { %539 = vmatprep.subr.bf16.mxu0 %v661_v0 }
  0x64   :  { %540 = vmatpush3.bf16.msra.mxu0 %v581_v23 }
  0x65   :  { %541 = vmatprep.subr.bf16.mxu0 %v661_v0 }
  0x68   :  { %542 = vmatpush3.bf16.msra.mxu0 %v582_v24 }
  0x69   :  { %543 = vmatprep.subr.bf16.mxu0 %v661_v0 }
  0x6c   :  { %544 = vmatpush3.bf16.msra.mxu0 %v583_v25 }
  0x6d   :  { %545 = vmatprep.subr.bf16.mxu0 %v661_v0 }
  0x70   :  { %546 = vmatpush3.bf16.msra.mxu0 %v584_v38 }
  0x71   :  { %547 = vmatprep.subr.bf16.mxu0 %v661_v0 }
  0x74   :  { %548 = vmatpush3.bf16.msra.mxu0 %v585_v39 }
 0x12a   :  { %v185_v27 = vpop.f32.mrb[0].mxu0 }
 0x12b   :  { %v186_v28 = vadd.f32 %v439_v26, %v185_v27  ;;  %v511_v29 = vpop.f32.mrb[1].mxu0 }
 0x12c   :  { %v188_v30 = vpop.f32.mrb[2].mxu0 }
 0x12d   :  { %v194_v31 = vmul.f32 0.01, %v186_v28  ;;  %v189_v32 = vadd.f32 %v439_v26, %v188_v30  ;;  %v512_v33 = vpop.f32.mrb[3].mxu0  ;;  %vm192_vm2 = vcmp.ge.f32.partialorder %v186_v28, 0.0 }
 0x12f   :  { %vm193_vm3 = vcmp.ge.f32.partialorder %v189_v32, 0.0  ;;  %v195_v34 = vmul.f32 0.01, %v189_v32  ;;  %v196_v35 = vsel %vm192_vm2, %v186_v28, %v194_v31 }
 0x131   :  { %v197_v36 = vsel %vm193_vm3, %v189_v32, %v195_v34 }
 0x132   :  { %v198_v37 = vpack.c.bf16 %v197_v36, %v196_v35 }
 0x134   :  { %530 = vmatmul.mubr.bf16.vlgmr.msra.gmra.mrb[0].mxu1 %v198_v37 }
 0x207   :  { %v304_v41 = vpop.f32.mrb[0].mxu1 }
 0x208   :  { %v305_v42 = vadd.f32 %v448_v40, %v304_v41  ;;  %v531_v43 = vpop.f32.mrb[1].mxu1 }
 0x209   :  { %v307_v44 = vpop.f32.mrb[2].mxu1 }
 0x20a   :  { %v313_v45 = vmul.f32 0.01, %v305_v42  ;;  %v308_v46 = vadd.f32 %v448_v40, %v307_v44  ;;  %v532_v47 = vpop.f32.mrb[3].mxu1  ;;  %vm311_vm4 = vcmp.ge.f32.partialorder %v305_v42, 0.0 }
 0x20c   :  { %vm312_vm5 = vcmp.ge.f32.partialorder %v308_v46, 0.0  ;;  %v314_v48 = vmul.f32 0.01, %v308_v46  ;;  %v315_v49 = vsel %vm311_vm4, %v305_v42, %v313_v45 }
 0x20e   :  { %v316_v50 = vsel %vm312_vm5, %v308_v46, %v314_v48 }
 0x20f   :  { %v317_v51 = vpack.c.bf16 %v316_v50, %v315_v49 }
 0x211   :  { %550 = vmatmul.mubr.bf16.vlgmr.msra.gmra.mrb[4].mxu0 %v317_v51 }
 0x2e4   :  { %v423_v53 = vpop.f32.mrb[4].mxu0 }
 0x2e5   :  { %v424_v54 = vadd.f32 %v457_v52, %v423_v53  ;;  %v551_v55 = vpop.f32.mrb[5].mxu0 }
 0x2e6   :  { %v426_v56 = vpop.f32.mrb[6].mxu0 }
 0x2e7   :  { %430 = vst [vmem:[%s811_s7] sm:$0xff] %v424_v54  ;;  %v427_v57 = vadd.f32 %v457_v52, %v426_v56  ;;  %v552_v58 = vpop.f32.mrb[7].mxu0 }
 0x2e9   :  { %431 = vst [vmem:[%s811_s7 + $0x8] sm:$0xff] %v427_v57 }
 0x2ea   :  { %436 = vsyncpa [#allocation4], 1 }
 0x2eb   :  { %437 = vsyncpa [#allocation6], 1 }

// kernel: _forward_impl.1
= control target key start
LH: loop header
LB: loop body
LE: loop exit
PB: predicated region body
PF: predicated region fallthrough
CT: control target
= control target key end

     0   :  { %12 = vsyncpa [#allocation4], 0  ;;  %s804_s0 = inlined_call_operand.vmem [shape: bf16[16,16], index: 0, kind: input, shape index: {}]   ;;  %s805_s1 = inlined_call_operand.hbm [shape: bf16[128,128], index: 1, kind: input, shape index: {}]   ;;  %s806_s2 = inlined_call_operand.vmem [shape: f32[1,128], index: 2, kind: input, shape index: {}]   ;;  %s807_s3 = inlined_call_operand.hbm [shape: bf16[128,128], index: 3, kind: input, shape index: {}]   ;;  %s808_s4 = inlined_call_operand.vmem [shape: f32[1,128], index: 4, kind: input, shape index: {}]   ;;  %s809_s5 = inlined_call_operand.hbm [shape: bf16[128,128], index: 5, kind: input, shape index: {}]   ;;  %s810_s6 = inlined_call_operand.vmem [shape: f32[1,128], index: 6, kind: input, shape index: {}]   ;;  %s811_s7 = inlined_call_operand.vmem [shape: f32[16,128], index: 7, kind: output, shape index: {}]  }
   0x1   :  { %13 = vsyncpa [#allocation6], 0  ;;  %s656_s24 = smov [#allocation5]   ;;  %s657_s26 = smov [#allocation3]  }
   0x2   :  { %s35_s25 = sshll.u32 %s656_s24, 4  ;;  %s21_s27 = sshll.u32 %s657_s26, 4  ;;  %s36_s25 = int_to_ptr.vmem [resolvable:$true] %s35_s25  ;;  %s704_s27 = int_to_ptr.vmem [resolvable:$true] %s21_s27 }
   0x3   :  { %s586_s30 = scalar_lea.hbm %s807_s3, 1024 }
   0x4   :  { %p587_p0 = scmp.ne.s32.totalorder %s807_s3, %s586_s30  ;;  %p590_p1 = scmp.lt.u32.totalorder %s586_s30, %s807_s3 }
   0x6   :  { %p592_p2 = pnand %p590_p1, %p587_p0 }
   0x8   :  { %595 = shalt.err (!%p592_p2)
}
   0x9   :  { %s596_s12 = scalar_lea.vmem %s36_s25, 1024  ;;  %p601_p4 = scmp.lt.s32.totalorder %s36_s25, %s36_s25 }
   0xa   :  { %p597_p3 = scmp.ne.s32.totalorder %s36_s25, %s596_s12  ;;  %p602_p5 = scmp.lt.s32.totalorder %s596_s12, %s596_s12 }
   0xc   :  { %p603_p6 = por %p602_p5, %p601_p4 }
   0xe   :  { %p604_p7 = pnand %p603_p6, %p597_p3 }
  0x10   :  { %607 = shalt.err (!%p604_p7)
}
  0x11   :  { %s658_s13 = smov 64   ;;  %s659_s14 = smov 4  }
  0x12   :  { %41 = dma.hbm_to_vmem [thread:$0]  %s807_s3, 1024, %s36_s25, [#allocation6], %s658_s13, %s658_s13, %s659_s14  }
  0x13   :  { %s608_s19 = scalar_lea.hbm %s805_s1, 1024 }
  0x14   :  { %p609_p8 = scmp.ne.s32.totalorder %s805_s1, %s608_s19  ;;  %p612_p9 = scmp.lt.u32.totalorder %s608_s19, %s805_s1 }
  0x16   :  { %p614_p10 = pnand %p612_p9, %p609_p8 }
  0x18   :  { %617 = shalt.err (!%p614_p10)
}
  0x19   :  { %s618_s24 = scalar_lea.vmem %s704_s27, 1024  ;;  %p623_p12 = scmp.lt.s32.totalorder %s704_s27, %s704_s27 }
  0x1a   :  { %p619_p11 = scmp.ne.s32.totalorder %s704_s27, %s618_s24  ;;  %p624_p13 = scmp.lt.s32.totalorder %s618_s24, %s618_s24 }
  0x1c   :  { %p625_p0 = por %p624_p13, %p623_p12 }
  0x1e   :  { %p626_p1 = pnand %p625_p0, %p619_p11 }
  0x20   :  { %629 = shalt.err (!%p626_p1)
}
  0x21   :  { %27 = dma.hbm_to_vmem [thread:$0]  %s805_s1, 1024, %s704_s27, [#allocation4], %s658_s13, %s658_s13, %s659_s14  }
  0x22   :  { %s660_s26 = smov [#allocation7]   ;;  %s630_s8 = scalar_lea.hbm %s809_s5, 1024 }
  0x23   :  { %s49_s28 = sshll.u32 %s660_s26, 4  ;;  %p631_p2 = scmp.ne.s32.totalorder %s809_s5, %s630_s8  ;;  %s50_s28 = int_to_ptr.vmem [resolvable:$true] %s49_s28 }
  0x24   :  { %p634_p3 = scmp.lt.u32.totalorder %s630_s8, %s809_s5 }
  0x26   :  { %p636_p4 = pnand %p634_p3, %p631_p2 }
  0x28   :  { %639 = shalt.err (!%p636_p4)
}
  0x29   :  { %s640_s15 = scalar_lea.vmem %s50_s28, 1024  ;;  %p645_p6 = scmp.lt.s32.totalorder %s50_s28, %s50_s28 }
  0x2a   :  { %p641_p5 = scmp.ne.s32.totalorder %s50_s28, %s640_s15  ;;  %p646_p7 = scmp.lt.s32.totalorder %s640_s15, %s640_s15 }
  0x2c   :  { %p647_p8 = por %p646_p7, %p645_p6 }
  0x2e   :  { %p648_p9 = pnand %p647_p8, %p641_p5 }
  0x30   :  { %651 = shalt.err (!%p648_p9)
}
  0x31   :  { %55 = dma.hbm_to_vmem [thread:$0]  %s809_s5, 1024, %s50_s28, [#allocation6], %s658_s13, %s658_s13, %s659_s14  }
  0x32   :  { %652 = dma.done.wait [#allocation4], 1024  }
  0x33   :  { %653 = vsyncadd [#allocation4], 4294966272 }
  0x34   :  { %654 = dma.done.wait [#allocation6], 2048  }
  0x35   :  { %655 = vsyncadd [#allocation6], 4294965248  ;;  %v661_v0 = vmov 0.0   ;;  %vm662_vm0 = vmmov 0   ;;  %v663_v1 = vmov 0   ;;  %v561_v2 = vld [vmem:[#allocation3] sm:$0xff]  }
  0x36   :  { %493 = vmatprep.subr.bf16.mxu0 %v661_v0  ;;  %509 = vmatprep.mubr.msk.bf16.mxu0 %vm662_vm0, %v661_v0  ;;  %68 = vst [vmem:[#allocation2] sm:$0xff] %v663_v1  ;;  %v562_v3 = vld [vmem:[#allocation3 + $0x8] sm:$0xff]   ;;  %v563_v4 = vld [vmem:[#allocation3 + $0x10] sm:$0xff]   ;;  %vm77_vm1 = vcmask 130048   ;;  %v569_v5 = vld [vmem:[%s804_s0] sm:$0xff]  }
  0x37   :  { %513 = vmatprep.subr.bf16.mxu1 %v661_v0  ;;  %529 = vmatprep.mubr.msk.bf16.mxu1 %vm662_vm0, %v661_v0  ;;  %v570_v6 = vld [vmem:[#allocation5] sm:$0xff]   ;;  %v564_v7 = vld [vmem:[#allocation3 + $0x18] sm:$0xff]   ;;  %78 = vst.msk [vmem:[#allocation2] sm:$0xff] %vm77_vm1, %v569_v5  ;;  %v571_v8 = vld [vmem:[#allocation5 + $0x8] sm:$0xff]  }
  0x38   :  { %494 = vmatpush3.bf16.msra.mxu0 %v561_v2  ;;  %514 = vmatpush3.bf16.msra.mxu1 %v570_v6  ;;  %v565_v9 = vld [vmem:[#allocation3 + $0x20] sm:$0xff]   ;;  %v572_v10 = vld [vmem:[#allocation5 + $0x10] sm:$0xff]   ;;  %v566_v11 = vld [vmem:[#allocation3 + $0x28] sm:$0xff]  }
  0x39   :  { %495 = vmatprep.subr.bf16.mxu0 %v661_v0  ;;  %515 = vmatprep.subr.bf16.mxu1 %v661_v0  ;;  %v573_v12 = vld [vmem:[#allocation5 + $0x18] sm:$0xff]   ;;  %v567_v13 = vld [vmem:[#allocation3 + $0x30] sm:$0xff]   ;;  %v574_v14 = vld [vmem:[#allocation5 + $0x20] sm:$0xff]  }
  0x3a   :  { %v568_v15 = vld [vmem:[#allocation3 + $0x38] sm:$0xff]   ;;  %v575_v16 = vld [vmem:[#allocation5 + $0x28] sm:$0xff]   ;;  %v576_v18 = vld [vmem:[#allocation5 + $0x30] sm:$0xff]  }
  0x3b   :  { %v577_v19 = vld [vmem:[#allocation5 + $0x38] sm:$0xff]   ;;  %v578_v20 = vld [vmem:[#allocation7] sm:$0xff]   ;;  %v579_v21 = vld [vmem:[#allocation7 + $0x8] sm:$0xff]  }
  0x3c   :  { %496 = vmatpush3.bf16.msra.mxu0 %v562_v3  ;;  %516 = vmatpush3.bf16.msra.mxu1 %v571_v8  ;;  %v580_v22 = vld [vmem:[#allocation7 + $0x10] sm:$0xff]   ;;  %v581_v23 = vld [vmem:[#allocation7 + $0x18] sm:$0xff]   ;;  %v582_v24 = vld [vmem:[#allocation7 + $0x20] sm:$0xff]  }
  0x3d   :  { %497 = vmatprep.subr.bf16.mxu0 %v661_v0  ;;  %517 = vmatprep.subr.bf16.mxu1 %v661_v0  ;;  %v583_v25 = vld [vmem:[#allocation7 + $0x28] sm:$0xff]   ;;  %v439_v26 = vld [vmem:[%s806_s2] ss:$0 sm:$0xff]  ;;  %v584_v38 = vld [vmem:[#allocation7 + $0x30] sm:$0xff]  }
  0x3e   :  { %v79_v17 = vld [vmem:[#allocation2] sm:$0xff] }
  0x3f   :  { %v585_v39 = vld [vmem:[#allocation7 + $0x38] sm:$0xff]  }
  0x40   :  { %498 = vmatpush3.bf16.msra.mxu0 %v563_v4  ;;  %518 = vmatpush3.bf16.msra.mxu1 %v572_v10  ;;  %v448_v40 = vld [vmem:[%s808_s4] ss:$0 sm:$0xff] }
  0x41   :  { %499 = vmatprep.subr.bf16.mxu0 %v661_v0  ;;  %519 = vmatprep.subr.bf16.mxu1 %v661_v0  ;;  %v457_v52 = vld [vmem:[%s810_s6] ss:$0 sm:$0xff] }
  0x44   :  { %500 = vmatpush3.bf16.msra.mxu0 %v564_v7  ;;  %520 = vmatpush3.bf16.msra.mxu1 %v573_v12 }
  0x45   :  { %501 = vmatprep.subr.bf16.mxu0 %v661_v0  ;;  %521 = vmatprep.subr.bf16.mxu1 %v661_v0 }
  0x48   :  { %502 = vmatpush3.bf16.msra.mxu0 %v565_v9  ;;  %522 = vmatpush3.bf16.msra.mxu1 %v574_v14 }
  0x49   :  { %503 = vmatprep.subr.bf16.mxu0 %v661_v0  ;;  %523 = vmatprep.subr.bf16.mxu1 %v661_v0 }
  0x4c   :  { %504 = vmatpush3.bf16.msra.mxu0 %v566_v11  ;;  %524 = vmatpush3.bf16.msra.mxu1 %v575_v16 }
  0x4d   :  { %505 = vmatprep.subr.bf16.mxu0 %v661_v0  ;;  %525 = vmatprep.subr.bf16.mxu1 %v661_v0 }
  0x50   :  { %506 = vmatpush3.bf16.msra.mxu0 %v567_v13  ;;  %526 = vmatpush3.bf16.msra.mxu1 %v576_v18 }
  0x51   :  { %507 = vmatprep.subr.bf16.mxu0 %v661_v0  ;;  %527 = vmatprep.subr.bf16.mxu1 %v661_v0 }
  0x54   :  { %508 = vmatpush3.bf16.msra.mxu0 %v568_v15  ;;  %528 = vmatpush3.bf16.msra.mxu1 %v577_v19 }
  0x55   :  { %533 = vmatprep.subr.bf16.mxu0 %v661_v0 }
  0x57   :  { %510 = vmatmul.mubr.bf16.vlgmr.msra.gmra.mrb[0].mxu0 %v79_v17 }
  0x58   :  { %549 = vmatprep.mubr.msk.bf16.mxu0 %vm662_vm0, %v661_v0  ;;  %534 = vmatpush3.bf16.msra.mxu0 %v578_v20 }
  0x59   :  { %535 = vmatprep.subr.bf16.mxu0 %v661_v0 }
  0x5c   :  { %536 = vmatpush3.bf16.msra.mxu0 %v579_v21 }
  0x5d   :  { %537 = vmatprep.subr.bf16.mxu0 %v661_v0 }
  0x60   :  { %538 = vmatpush3.bf16.msra.mxu0 %v580_v22 }
  0x61   :  { %539 = vmatprep.subr.bf16.mxu0 %v661_v0 }
  0x64   :  { %540 = vmatpush3.bf16.msra.mxu0 %v581_v23 }
  0x65   :  { %541 = vmatprep.subr.bf16.mxu0 %v661_v0 }
  0x68   :  { %542 = vmatpush3.bf16.msra.mxu0 %v582_v24 }
  0x69   :  { %543 = vmatprep.subr.bf16.mxu0 %v661_v0 }
  0x6c   :  { %544 = vmatpush3.bf16.msra.mxu0 %v583_v25 }
  0x6d   :  { %545 = vmatprep.subr.bf16.mxu0 %v661_v0 }
  0x70   :  { %546 = vmatpush3.bf16.msra.mxu0 %v584_v38 }
  0x71   :  { %547 = vmatprep.subr.bf16.mxu0 %v661_v0 }
  0x74   :  { %548 = vmatpush3.bf16.msra.mxu0 %v585_v39 }
 0x12a   :  { %v185_v27 = vpop.f32.mrb[0].mxu0 }
 0x12b   :  { %v186_v28 = vadd.f32 %v439_v26, %v185_v27  ;;  %v511_v29 = vpop.f32.mrb[1].mxu0 }
 0x12c   :  { %v188_v30 = vpop.f32.mrb[2].mxu0 }
 0x12d   :  { %v194_v31 = vmul.f32 0.01, %v186_v28  ;;  %v189_v32 = vadd.f32 %v439_v26, %v188_v30  ;;  %v512_v33 = vpop.f32.mrb[3].mxu0  ;;  %vm192_vm2 = vcmp.ge.f32.partialorder %v186_v28, 0.0 }
 0x12f   :  { %vm193_vm3 = vcmp.ge.f32.partialorder %v189_v32, 0.0  ;;  %v195_v34 = vmul.f32 0.01, %v189_v32  ;;  %v196_v35 = vsel %vm192_vm2, %v186_v28, %v194_v31 }
 0x131   :  { %v197_v36 = vsel %vm193_vm3, %v189_v32, %v195_v34 }
 0x132   :  { %v198_v37 = vpack.c.bf16 %v197_v36, %v196_v35 }
 0x134   :  { %530 = vmatmul.mubr.bf16.vlgmr.msra.gmra.mrb[0].mxu1 %v198_v37 }
 0x207   :  { %v304_v41 = vpop.f32.mrb[0].mxu1 }
 0x208   :  { %v305_v42 = vadd.f32 %v448_v40, %v304_v41  ;;  %v531_v43 = vpop.f32.mrb[1].mxu1 }
 0x209   :  { %v307_v44 = vpop.f32.mrb[2].mxu1 }
 0x20a   :  { %v313_v45 = vmul.f32 0.01, %v305_v42  ;;  %v308_v46 = vadd.f32 %v448_v40, %v307_v44  ;;  %v532_v47 = vpop.f32.mrb[3].mxu1  ;;  %vm311_vm4 = vcmp.ge.f32.partialorder %v305_v42, 0.0 }
 0x20c   :  { %vm312_vm5 = vcmp.ge.f32.partialorder %v308_v46, 0.0  ;;  %v314_v48 = vmul.f32 0.01, %v308_v46  ;;  %v315_v49 = vsel %vm311_vm4, %v305_v42, %v313_v45 }
 0x20e   :  { %v316_v50 = vsel %vm312_vm5, %v308_v46, %v314_v48 }
 0x20f   :  { %v317_v51 = vpack.c.bf16 %v316_v50, %v315_v49 }
 0x211   :  { %550 = vmatmul.mubr.bf16.vlgmr.msra.gmra.mrb[4].mxu0 %v317_v51 }
 0x2e4   :  { %v423_v53 = vpop.f32.mrb[4].mxu0 }
 0x2e5   :  { %v424_v54 = vadd.f32 %v457_v52, %v423_v53  ;;  %v551_v55 = vpop.f32.mrb[5].mxu0 }
 0x2e6   :  { %v426_v56 = vpop.f32.mrb[6].mxu0 }
 0x2e7   :  { %430 = vst [vmem:[%s811_s7] sm:$0xff] %v424_v54  ;;  %v427_v57 = vadd.f32 %v457_v52, %v426_v56  ;;  %v552_v58 = vpop.f32.mrb[7].mxu0 }
 0x2e9   :  { %431 = vst [vmem:[%s811_s7 + $0x8] sm:$0xff] %v427_v57 }
 0x2ea   :  { %436 = vsyncpa [#allocation4], 1 }
 0x2eb   :  { %437 = vsyncpa [#allocation6], 1 }

</bundles_post_ra>
